<compile_context>
chip_gen: v7x
topology: tpu7x:2x2x1
jax: 0.10.0
libtpu: 0.0.40
codegen_flags: <defaults>
</compile_context>

<pallas_src>
import jax
import jax.numpy as jnp
from jax import lax
from jax.experimental import pallas as pl
from jax.experimental.pallas import tpu as pltpu


def _round_up(x, m):
    return ((x + m - 1) // m) * m


# ---------------------------------------------------------------------------
# Fused kernel: tanh recurrence over one time chunk + output projection.
# Grid = (batch_block, time_chunk); time chunk is the minor-most axis.
# ---------------------------------------------------------------------------
def _make_fused_rnn_kernel(t_chunk, b_blk, hp, vp, last_chunk, last_local):
    def kernel(pre_ref, w_hh_ref, w_out_ref, b_out_ref, h0_ref,
               logits_ref, hlast_ref, h_carry, h_seq):
        # pre_ref:    (t_chunk, b_blk, hp)  precomputed W_ih[token] + b_rnn
        # w_hh_ref:   (hp, hp)              hidden->hidden weight (pre-transposed)
        # w_out_ref:  (hp, vp)              output projection weight
        # b_out_ref:  (1, vp)               output projection bias
        # h0_ref:     (b_blk, hp)           initial hidden state of this block
        # logits_ref: (t_chunk, b_blk, vp)  fused projection output
        # hlast_ref:  (b_blk, hp)           final hidden state (resident block)
        # h_carry:    (b_blk, hp)  VMEM     carry across time chunks
        # h_seq:      (t_chunk, b_blk, hp) VMEM  this chunk's hidden states
        c = pl.program_id(1)

        # NOTE: h_carry correctness relies on the time-chunk axis (grid axis 1)
        # being minor-most and iterated in order per batch block ("arbitrary").
        @pl.when(c == 0)
        def _():
            h_carry[...] = h0_ref[...]

        w_hh = w_hh_ref[...]                       # hoisted out of the time loop

        def step(i, h):
            h = jnp.tanh(pre_ref[i] +
                         jnp.dot(h, w_hh, preferred_element_type=jnp.float32))
            h_seq[i] = h
            return h

        h = lax.fori_loop(0, t_chunk, step, h_carry[...])
        h_carry[...] = h                           # carry to next chunk

        # Final hidden state of the *real* (un-padded) sequence.
        @pl.when(c == last_chunk)
        def _():
            hlast_ref[...] = h_seq[last_local]

        # Fused output projection for the whole chunk: one big lane-dense MXU
        # matmul; the MXU slot is otherwise idle during the latency-bound
        # recurrence, so this is effectively free and drops an HBM round trip.
        hs = h_seq[...].reshape(t_chunk * b_blk, hp)
        logits = jnp.dot(hs, w_out_ref[...],
                         preferred_element_type=jnp.float32) + b_out_ref[...]
        logits_ref[...] = logits.reshape(t_chunk, b_blk, vp)

    return kernel


# ---------------------------------------------------------------------------
# One-time parameter preparation (padding hoisted out of the forward pass).
# Params use the "x @ W" convention: w_ih = W_ih^T (V,H), w_hh = W_hh^T (H,H),
# b_rnn = b_ih + b_hh, w_out = Linear.weight^T (H,V), b_out = Linear.bias.
# ---------------------------------------------------------------------------
def prepare_rnn_model(params, vocab_size):
    w_ih, w_hh, b_rnn, w_out, b_out = params
    hidden = w_hh.shape[0]
    hp = _round_up(max(hidden, 128), 128)
    vp = _round_up(max(vocab_size, 128), 128)
    f32 = jnp.float32
    w_ih_p = jnp.zeros((vocab_size, hp), f32).at[:, :hidden].set(w_ih.astype(f32))
    w_hh_p = jnp.zeros((hp, hp), f32).at[:hidden, :hidden].set(w_hh.astype(f32))
    b_rnn_p = jnp.zeros((1, hp), f32).at[:, :hidden].set(
        b_rnn.reshape(1, -1).astype(f32))
    w_out_p = jnp.zeros((hp, vp), f32).at[:hidden, :vocab_size].set(w_out.astype(f32))
    b_out_p = jnp.zeros((1, vp), f32).at[:, :vocab_size].set(
        b_out.reshape(1, -1).astype(f32))
    return dict(w_ih=w_ih_p, w_hh=w_hh_p, b_rnn=b_rnn_p, w_out=w_out_p,
                b_out=b_out_p, hidden=hidden, vocab=vocab_size, hp=hp, vp=vp)


def _num_batch_blocks(bp):
    # v7x has 2 TensorCores/chip -> split the batch once across cores.
    # v5e/v6e are single-TC: splitting only serializes the recurrence twice.
    try:
        kind = jax.devices()[0].device_kind.lower()
    except Exception:
        kind = ""
    if ("v7" in kind or "7x" in kind) and bp % 16 == 0:
        return 2
    return 1


# ---------------------------------------------------------------------------
# Forward pass == RNNModel.forward
# ---------------------------------------------------------------------------
def rnn_model_forward(inputs, state, prepared, *, t_chunk=32):
    """inputs: (batch, seq) int token ids; state: (1, batch, hidden) f32.
    Returns (output, new_state): output (seq*batch, vocab), state (1,batch,hidden)."""
    hidden, vocab = prepared["hidden"], prepared["vocab"]
    hp, vp = prepared["hp"], prepared["vp"]
    batch, seq = inputs.shape
    f32 = jnp.float32

    bp = _round_up(batch, 8)                       # sublane-aligned batch
    n_bb = _num_batch_blocks(bp)
    b_blk = bp // n_bb

    tc = max(1, min(t_chunk, seq))
    n_chunks = pl.cdiv(seq, tc)
    seq_pad = n_chunks * tc                        # ragged seq -> zero-padded chunk
    last_chunk = (seq - 1) // tc
    last_local = (seq - 1) % tc

    # Hoisted off the serial chain: x_onehot @ W_ih == W_ih[token]; fold the RNN
    # bias in once.  Padded rows/steps stay exactly 0 through tanh (zero weights).
    ids_tm = inputs.T.astype(jnp.int32)                                  # (seq, batch)
    pre = jnp.take(prepared["w_ih"], ids_tm, axis=0) + prepared["b_rnn"]  # (seq,B,hp)
    pre_p = jnp.zeros((seq_pad, bp, hp), f32).at[:seq, :batch, :].set(pre)

    h0_p = jnp.zeros((bp, hp), f32).at[:batch, :hidden].set(state[0].astype(f32))

    grid_spec = pltpu.PrefetchScalarGridSpec(
        num_scalar_prefetch=0,
        grid=(n_bb, n_chunks),
        in_specs=[
            pl.BlockSpec((tc, b_blk, hp), lambda bb, c: (c, bb, 0)),   # pre-gathered x
            pl.BlockSpec((hp, hp), lambda bb, c: (0, 0)),              # W_hh (invariant)
            pl.BlockSpec((hp, vp), lambda bb, c: (0, 0)),              # W_out (invariant)
            pl.BlockSpec((1, vp), lambda bb, c: (0, 0)),               # b_out (invariant)
            pl.BlockSpec((b_blk, hp), lambda bb, c: (bb, 0)),          # h0
        ],
        out_specs=(
            pl.BlockSpec((tc, b_blk, vp), lambda bb, c: (c, bb, 0)),   # fused logits
            pl.BlockSpec((b_blk, hp), lambda bb, c: (bb, 0)),          # final hidden
        ),
        scratch_shapes=[
            pltpu.VMEM((b_blk, hp), jnp.float32),        # h carry across chunks
            pltpu.VMEM((tc, b_blk, hp), jnp.float32),    # chunk hidden states
        ],
    )

    logits_p, hlast_p = pl.pallas_call(
        _make_fused_rnn_kernel(tc, b_blk, hp, vp, last_chunk, last_local),
        grid_spec=grid_spec,
        out_shape=(
            jax.ShapeDtypeStruct((seq_pad, bp, vp), jnp.float32),
            jax.ShapeDtypeStruct((bp, hp), jnp.float32),
        ),
        compiler_params=pltpu.CompilerParams(
            dimension_semantics=("parallel", "arbitrary"),
            vmem_limit_bytes=48 * 1024 * 1024,      # headroom under v7x's 64 MiB
        ),
    )(pre_p, prepared["w_hh"], prepared["w_out"], prepared["b_out"], h0_p)

    # Strip padding only when actually padded (matches module's (seq*batch, vocab)).
    logits = logits_p
    if seq_pad != seq or bp != batch or vp != vocab:
        logits = logits_p[:seq, :batch, :vocab]
    output = logits.reshape(seq * batch, vocab)
    new_state = hlast_p[:batch, :hidden][None]
    return output, new_state


# ---------------------------------------------------------------------------
# Pure-JAX reference (mirrors PyTorch nn.RNN(tanh) + nn.Linear semantics).
# ---------------------------------------------------------------------------
def reference_forward(inputs, state, params, vocab_size):
    w_ih, w_hh, b_rnn, w_out, b_out = params
    X = jax.nn.one_hot(inputs.T, vocab_size, dtype=jnp.float32)    # (seq, B, V)
    h0 = state[0]

    def step(h, x_t):
        h_new = jnp.tanh(x_t @ w_ih + h @ w_hh + b_rnn)
        return h_new, h_new

    h_last, Y = jax.lax.scan(step, h0, X)                          # Y: (seq, B, H)
    out = Y.reshape(-1, Y.shape[-1]) @ w_out + b_out
    return out, h_last[None]


if __name__ == "__main__":
    # Small shapes consistent with the module's forward.
    batch, seq = 16, 32
    vocab_size = 32
    num_hiddens = 32

    key = jax.random.PRNGKey(0)
    k_in, k_ih, k_hh, k_bi, k_bh, k_wo, k_bo, k_h0 = jax.random.split(key, 8)

    scale = 0.1
    w_ih = scale * jax.random.normal(k_ih, (vocab_size, num_hiddens), jnp.float32)
    w_hh = scale * jax.random.normal(k_hh, (num_hiddens, num_hiddens), jnp.float32)
    b_rnn = (scale * jax.random.normal(k_bi, (1, num_hiddens), jnp.float32)
             + scale * jax.random.normal(k_bh, (1, num_hiddens), jnp.float32))
    w_out = scale * jax.random.normal(k_wo, (num_hiddens, vocab_size), jnp.float32)
    b_out = scale * jax.random.normal(k_bo, (1, vocab_size), jnp.float32)
    params = (w_ih, w_hh, b_rnn, w_out, b_out)

    inputs = jax.random.randint(k_in, (batch, seq), 0, vocab_size, dtype=jnp.int32)
    state0 = 0.1 * jax.random.normal(k_h0, (1, batch, num_hiddens), jnp.float32)

    prepared = prepare_rnn_model(params, vocab_size)               # one-time padding
    output, new_state = rnn_model_forward(inputs, state0, prepared, vocab_size and params and vocab_size and 32 and None or None) if False else rnn_model_forward(inputs, state0, prepared)
    output = jax.block_until_ready(output)
    new_state = jax.block_until_ready(new_state)

    ref_out, ref_state = reference_forward(inputs, state0, params, vocab_size)
    assert output.shape == (seq * batch, vocab_size)
    assert new_state.shape == (1, batch, num_hiddens)
    assert jnp.allclose(output, ref_out, atol=2e-4, rtol=2e-4)
    assert jnp.allclose(new_state, ref_state, atol=2e-4, rtol=2e-4)

    print("KERNEL_OK")
</pallas_src>

<mosaic_0001>
module attributes {stable_mosaic.version = 11 : i64} {
  func.func @kernel(%arg0: i32, %arg1: i32, %arg2: memref<32x16x128xf32, #tpu.memory_space<vmem>>, %arg3: memref<128x128xf32, #tpu.memory_space<vmem>>, %arg4: memref<128x128xf32, #tpu.memory_space<vmem>>, %arg5: memref<1x128xf32, #tpu.memory_space<vmem>>, %arg6: memref<16x128xf32, #tpu.memory_space<vmem>>, %arg7: memref<32x16x128xf32, #tpu.memory_space<vmem>>, %arg8: memref<16x128xf32, #tpu.memory_space<vmem>>, %arg9: memref<16x128xf32, #tpu.memory_space<vmem>>, %arg10: memref<32x16x128xf32, #tpu.memory_space<vmem>>) attributes {dimension_semantics = [#tpu.dimension_semantics<parallel>, #tpu.dimension_semantics<arbitrary>], iteration_bounds = array<i64: 1, 1>, scalar_prefetch = 0 : i64, scratch_operands = 2 : i64, tpu.core_type = #tpu.core_type<tc>, window_params = [{transform_indices = @transform_0, window_bounds = array<i64: 32, 16, 128>}, {pipeline_mode = #tpu.pipeline_mode<synchronous>, transform_indices = @transform_1, window_bounds = array<i64: 128, 128>}, {pipeline_mode = #tpu.pipeline_mode<synchronous>, transform_indices = @transform_2, window_bounds = array<i64: 128, 128>}, {pipeline_mode = #tpu.pipeline_mode<synchronous>, transform_indices = @transform_3, window_bounds = array<i64: 1, 128>}, {transform_indices = @transform_4, window_bounds = array<i64: 16, 128>}, {transform_indices = @transform_5, window_bounds = array<i64: 32, 16, 128>}, {transform_indices = @transform_6, window_bounds = array<i64: 16, 128>}]} {
    %c0_i32 = arith.constant 0 : i32
    %0 = arith.cmpi eq, %arg1, %c0_i32 : i32
    %1 = arith.extui %0 : i1 to i32
    %c0_i32_0 = arith.constant 0 : i32
    %2 = arith.cmpi ne, %1, %c0_i32_0 : i32
    scf.if %2 {
      %c0_20 = arith.constant 0 : index
      %c0_21 = arith.constant 0 : index
      %20 = vector.load %arg6[%c0_20, %c0_21] : memref<16x128xf32, #tpu.memory_space<vmem>>, vector<16x128xf32>
      %c0_22 = arith.constant 0 : index
      %c0_23 = arith.constant 0 : index
      %21 = vector.load %arg9[%c0_22, %c0_23] : memref<16x128xf32, #tpu.memory_space<vmem>>, vector<16x128xf32>
      tpu.vector_store %arg9[%c0_22, %c0_23], %20 {strides = array<i32>} : memref<16x128xf32, #tpu.memory_space<vmem>>, vector<16x128xf32>,
    } else {
    }
    %c0 = arith.constant 0 : index
    %c0_1 = arith.constant 0 : index
    %3 = vector.load %arg3[%c0, %c0_1] : memref<128x128xf32, #tpu.memory_space<vmem>>, vector<128x128xf32>
    %c0_2 = arith.constant 0 : index
    %c0_3 = arith.constant 0 : index
    %4 = vector.load %arg9[%c0_2, %c0_3] : memref<16x128xf32, #tpu.memory_space<vmem>>, vector<16x128xf32>
    %c0_i32_4 = arith.constant 0 : i32
    %c32_i32 = arith.constant 32 : i32
    %5 = arith.addi %c0_i32_4, %c32_i32 : i32
    %c1_i32 = arith.constant 1 : i32
    %6 = scf.for %arg11 = %c0_i32_4 to %5 step %c1_i32 iter_args(%arg12 = %4) -> (vector<16x128xf32>)  : i32 {
      %20 = arith.index_cast %arg11 : i32 to index
      %c0_20 = arith.constant 0 : index
      %c0_21 = arith.constant 0 : index
      %21 = vector.load %arg2[%20, %c0_20, %c0_21] : memref<32x16x128xf32, #tpu.memory_space<vmem>>, vector<1x16x128xf32>
      %22 = vector.shape_cast %21 : vector<1x16x128xf32> to vector<16x128xf32>
      %cst_22 = arith.constant dense<0.000000e+00> : vector<16x128xf32>
      %23 = tpu.matmul %arg12, %3, %cst_22 {dimension_numbers = #tpu.dot_dimension_numbers<[1], [0], [0], [1], [0, 0, 1, 1], [], []>} : vector<16x128xf32>, vector<128x128xf32>, vector<16x128xf32> -> vector<16x128xf32>
      %24 = arith.addf %22, %23 : vector<16x128xf32>
      %25 = math.tanh %24 : vector<16x128xf32>
      %26 = arith.index_cast %arg11 : i32 to index
      %c0_23 = arith.constant 0 : index
      %c0_24 = arith.constant 0 : index
      %27 = vector.load %arg10[%26, %c0_23, %c0_24] : memref<32x16x128xf32, #tpu.memory_space<vmem>>, vector<1x16x128xf32>
      %28 = vector.shape_cast %27 : vector<1x16x128xf32> to vector<16x128xf32>
      %29 = vector.shape_cast %25 : vector<16x128xf32> to vector<1x16x128xf32>
      tpu.vector_store %arg10[%26, %c0_23, %c0_24], %29 {strides = array<i32>} : memref<32x16x128xf32, #tpu.memory_space<vmem>>, vector<1x16x128xf32>,
      scf.yield %25 : vector<16x128xf32>
    }
    %c32_i32_5 = arith.constant 32 : i32
    %c0_6 = arith.constant 0 : index
    %c0_7 = arith.constant 0 : index
    %7 = vector.load %arg9[%c0_6, %c0_7] : memref<16x128xf32, #tpu.memory_space<vmem>>, vector<16x128xf32>
    tpu.vector_store %arg9[%c0_6, %c0_7], %6 {strides = array<i32>} : memref<16x128xf32, #tpu.memory_space<vmem>>, vector<16x128xf32>,
    %c0_i32_8 = arith.constant 0 : i32
    %8 = arith.cmpi eq, %arg1, %c0_i32_8 : i32
    %9 = arith.extui %8 : i1 to i32
    %c0_i32_9 = arith.constant 0 : i32
    %10 = arith.cmpi ne, %9, %c0_i32_9 : i32
    scf.if %10 {
      %c31 = arith.constant 31 : index
      %c0_20 = arith.constant 0 : index
      %c0_21 = arith.constant 0 : index
      %20 = vector.load %arg10[%c31, %c0_20, %c0_21] : memref<32x16x128xf32, #tpu.memory_space<vmem>>, vector<1x16x128xf32>
      %21 = vector.shape_cast %20 : vector<1x16x128xf32> to vector<16x128xf32>
      %c0_22 = arith.constant 0 : index
      %c0_23 = arith.constant 0 : index
      %22 = vector.load %arg8[%c0_22, %c0_23] : memref<16x128xf32, #tpu.memory_space<vmem>>, vector<16x128xf32>
      tpu.vector_store %arg8[%c0_22, %c0_23], %21 {strides = array<i32>} : memref<16x128xf32, #tpu.memory_space<vmem>>, vector<16x128xf32>,
    } else {
    }
    %c0_10 = arith.constant 0 : index
    %c0_11 = arith.constant 0 : index
    %c0_12 = arith.constant 0 : index
    %11 = vector.load %arg10[%c0_10, %c0_11, %c0_12] : memref<32x16x128xf32, #tpu.memory_space<vmem>>, vector<32x16x128xf32>
    %12 = vector.shape_cast %11 : vector<32x16x128xf32> to vector<512x128xf32>
    %c0_13 = arith.constant 0 : index
    %c0_14 = arith.constant 0 : index
    %13 = vector.load %arg4[%c0_13, %c0_14] : memref<128x128xf32, #tpu.memory_space<vmem>>, vector<128x128xf32>
    %cst = arith.constant dense<0.000000e+00> : vector<512x128xf32>
    %14 = tpu.matmul %12, %13, %cst {dimension_numbers = #tpu.dot_dimension_numbers<[1], [0], [0], [1], [0, 0, 1, 1], [], []>} : vector<512x128xf32>, vector<128x128xf32>, vector<512x128xf32> -> vector<512x128xf32>
    %c0_15 = arith.constant 0 : index
    %c0_16 = arith.constant 0 : index
    %15 = vector.load %arg5[%c0_15, %c0_16] : memref<1x128xf32, #tpu.memory_space<vmem>>, vector<1x128xf32>
    %16 = vector.broadcast %15 : vector<1x128xf32> to vector<512x128xf32>
    %17 = arith.addf %14, %16 : vector<512x128xf32>
    %18 = vector.shape_cast %17 : vector<512x128xf32> to vector<32x16x128xf32>
    %c0_17 = arith.constant 0 : index
    %c0_18 = arith.constant 0 : index
    %c0_19 = arith.constant 0 : index
    %19 = vector.load %arg7[%c0_17, %c0_18, %c0_19] : memref<32x16x128xf32, #tpu.memory_space<vmem>>, vector<32x16x128xf32>
    tpu.vector_store %arg7[%c0_17, %c0_18, %c0_19], %18 {strides = array<i32>} : memref<32x16x128xf32, #tpu.memory_space<vmem>>, vector<32x16x128xf32>,
    return
  }
  func.func @transform_0(%arg0: i32, %arg1: i32) -> (i32, i32, i32) {
    %c0_i32 = arith.constant 0 : i32
    %c0_i32_0 = arith.constant 0 : i32
    return %arg1, %arg0, %c0_i32 : i32, i32, i32
  }
  func.func @transform_1(%arg0: i32, %arg1: i32) -> (i32, i32) {
    %c0_i32 = arith.constant 0 : i32
    %c0_i32_0 = arith.constant 0 : i32
    %c0_i32_1 = arith.constant 0 : i32
    return %c0_i32, %c0_i32_0 : i32, i32
  }
  func.func @transform_2(%arg0: i32, %arg1: i32) -> (i32, i32) {
    %c0_i32 = arith.constant 0 : i32
    %c0_i32_0 = arith.constant 0 : i32
    %c0_i32_1 = arith.constant 0 : i32
    return %c0_i32, %c0_i32_0 : i32, i32
  }
  func.func @transform_3(%arg0: i32, %arg1: i32) -> (i32, i32) {
    %c0_i32 = arith.constant 0 : i32
    %c0_i32_0 = arith.constant 0 : i32
    %c0_i32_1 = arith.constant 0 : i32
    return %c0_i32, %c0_i32_0 : i32, i32
  }
  func.func @transform_4(%arg0: i32, %arg1: i32) -> (i32, i32) {
    %c0_i32 = arith.constant 0 : i32
    %c0_i32_0 = arith.constant 0 : i32
    return %arg0, %c0_i32 : i32, i32
  }
  func.func @transform_5(%arg0: i32, %arg1: i32) -> (i32, i32, i32) {
    %c0_i32 = arith.constant 0 : i32
    %c0_i32_0 = arith.constant 0 : i32
    return %arg1, %arg0, %c0_i32 : i32, i32, i32
  }
  func.func @transform_6(%arg0: i32, %arg1: i32) -> (i32, i32) {
    %c0_i32 = arith.constant 0 : i32
    %c0_i32_0 = arith.constant 0 : i32
    return %arg0, %c0_i32 : i32, i32
  }
}

</mosaic_0001>

<bundles_post_ra>
// kernel: tpu_custom_call.1
= control target key start
LH: loop header
LB: loop body
LE: loop exit
PB: predicated region body
PF: predicated region fallthrough
CT: control target
= control target key end

     0   :  { %12 = vsyncpa [#allocation5], 0  ;;  %s1603_s0 = inlined_call_operand.hbm [shape: f32[32,16,128], index: 0, kind: input, shape index: {}]   ;;  %s1604_s1 = inlined_call_operand.hbm [shape: f32[128,128], index: 1, kind: input, shape index: {}]   ;;  %s1605_s2 = inlined_call_operand.hbm [shape: f32[128,128], index: 2, kind: input, shape index: {}]   ;;  %s1606_s3 = inlined_call_operand.vmem [shape: f32[1,128], index: 3, kind: input, shape index: {}]   ;;  %s1607_s4 = inlined_call_operand.hbm [shape: f32[16,128], index: 4, kind: input, shape index: {}]   ;;  %s1608_s5 = inlined_call_operand.hbm [shape: f32[32,16,128], index: 5, kind: output, shape index: {0}]   ;;  %s1609_s6 = inlined_call_operand.hbm [shape: f32[16,128], index: 6, kind: output, shape index: {1}]  }
   0x1   :  { %13 = vsyncpa [#allocation8], 0 }
   0x2   :  { %14 = vsyncpa [#allocation11], 0 }
   0x3   :  { %15 = vsyncpa [#allocation6], 0 }
   0x4   :  { %16 = vsyncpa [#allocation14], 0  ;;  %s1340_s21 = smov [#allocation7]   ;;  %s1341_s23 = smov [#allocation4]  }
   0x5   :  { %s34_s22 = sshll.u32 %s1340_s21, 4  ;;  %s22_s24 = sshll.u32 %s1341_s23, 4  ;;  %s35_s22 = int_to_ptr.vmem [resolvable:$true] %s34_s22  ;;  %s1383_s24 = int_to_ptr.vmem [resolvable:$true] %s22_s24 }
   0x6   :  { %s1174_s27 = scalar_lea.hbm %s1604_s1, 2048 }
   0x7   :  { %p1175_p0 = scmp.ne.s32.totalorder %s1604_s1, %s1174_s27  ;;  %p1178_p1 = scmp.lt.u32.totalorder %s1174_s27, %s1604_s1 }
   0x9   :  { %p1180_p2 = pnand %p1178_p1, %p1175_p0 }
   0xb   :  { %1183 = shalt.err (!%p1180_p2)
}
   0xc   :  { %s1184_s8 = scalar_lea.vmem %s35_s22, 2048  ;;  %p1189_p4 = scmp.lt.s32.totalorder %s35_s22, %s35_s22 }
   0xd   :  { %p1185_p3 = scmp.ne.s32.totalorder %s35_s22, %s1184_s8  ;;  %p1190_p5 = scmp.lt.s32.totalorder %s1184_s8, %s1184_s8 }
   0xf   :  { %p1191_p6 = por %p1190_p5, %p1189_p4 }
  0x11   :  { %p1192_p7 = pnand %p1191_p6, %p1185_p3 }
  0x13   :  { %1195 = shalt.err (!%p1192_p7)
}
  0x14   :  { %s1342_s9 = smov 128   ;;  %s1343_s10 = smov 8  }
  0x15   :  { %40 = dma.hbm_to_vmem [thread:$0]  %s1604_s1, 2048, %s35_s22, [#allocation8], %s1342_s9, %s1342_s9, %s1343_s10  }
  0x16   :  { %s1196_s15 = scalar_lea.hbm %s1603_s0, 8192 }
  0x17   :  { %p1197_p8 = scmp.ne.s32.totalorder %s1603_s0, %s1196_s15  ;;  %p1200_p9 = scmp.lt.u32.totalorder %s1196_s15, %s1603_s0 }
  0x19   :  { %p1202_p10 = pnand %p1200_p9, %p1197_p8 }
  0x1b   :  { %1205 = shalt.err (!%p1202_p10)
}
  0x1c   :  { %s1206_s20 = scalar_lea.vmem %s1383_s24, 8192  ;;  %p1211_p12 = scmp.lt.s32.totalorder %s1383_s24, %s1383_s24 }
  0x1d   :  { %p1207_p11 = scmp.ne.s32.totalorder %s1383_s24, %s1206_s20  ;;  %p1212_p13 = scmp.lt.s32.totalorder %s1206_s20, %s1206_s20 }
  0x1f   :  { %p1213_p0 = por %p1212_p13, %p1211_p12 }
  0x21   :  { %p1214_p1 = pnand %p1213_p0, %p1207_p11 }
  0x23   :  { %1217 = shalt.err (!%p1214_p1)
}
  0x24   :  { %28 = dma.hbm_to_vmem [thread:$0]  %s1603_s0, 8192, %s1383_s24, [#allocation5], %s1342_s9, %s1342_s9, %s1343_s10  }
  0x25   :  { %s1344_s22 = smov [#allocation9]   ;;  %s1345_s25 = smov [#allocation10]  }
  0x26   :  { %s46_s23 = sshll.u32 %s1344_s22, 4  ;;  %s60_s26 = sshll.u32 %s1345_s25, 4  ;;  %s47_s23 = int_to_ptr.vmem [resolvable:$true] %s46_s23  ;;  %s1420_s26 = int_to_ptr.vmem [resolvable:$true] %s60_s26 }
  0x27   :  { %s1218_s29 = scalar_lea.hbm %s1605_s2, 2048 }
  0x28   :  { %p1219_p2 = scmp.ne.s32.totalorder %s1605_s2, %s1218_s29  ;;  %p1222_p3 = scmp.lt.u32.totalorder %s1218_s29, %s1605_s2 }
  0x2a   :  { %p1224_p4 = pnand %p1222_p3, %p1219_p2 }
  0x2c   :  { %1227 = shalt.err (!%p1224_p4)
}
  0x2d   :  { %s1228_s0 = scalar_lea.vmem %s47_s23, 2048  ;;  %p1233_p6 = scmp.lt.s32.totalorder %s47_s23, %s47_s23 }
  0x2e   :  { %p1229_p5 = scmp.ne.s32.totalorder %s47_s23, %s1228_s0  ;;  %p1234_p7 = scmp.lt.s32.totalorder %s1228_s0, %s1228_s0 }
  0x30   :  { %p1235_p8 = por %p1234_p7, %p1233_p6 }
  0x32   :  { %p1236_p9 = pnand %p1235_p8, %p1229_p5 }
  0x34   :  { %1239 = shalt.err (!%p1236_p9)
}
  0x35   :  { %52 = dma.hbm_to_vmem [thread:$0]  %s1605_s2, 2048, %s47_s23, [#allocation8], %s1342_s9, %s1342_s9, %s1343_s10  }
  0x36   :  { %s1240_s15 = scalar_lea.hbm %s1607_s4, 256 }
  0x37   :  { %p1241_p10 = scmp.ne.s32.totalorder %s1607_s4, %s1240_s15  ;;  %p1244_p11 = scmp.lt.u32.totalorder %s1240_s15, %s1607_s4 }
  0x39   :  { %p1246_p12 = pnand %p1244_p11, %p1241_p10 }
  0x3b   :  { %1249 = shalt.err (!%p1246_p12)
}
  0x3c   :  { %s1250_s20 = scalar_lea.vmem %s1420_s26, 256  ;;  %p1255_p0 = scmp.lt.s32.totalorder %s1420_s26, %s1420_s26 }
  0x3d   :  { %p1251_p13 = scmp.ne.s32.totalorder %s1420_s26, %s1250_s20  ;;  %p1256_p1 = scmp.lt.s32.totalorder %s1250_s20, %s1250_s20 }
  0x3f   :  { %p1257_p2 = por %p1256_p1, %p1255_p0 }
  0x41   :  { %p1258_p3 = pnand %p1257_p2, %p1251_p13 }
  0x43   :  { %1261 = shalt.err (!%p1258_p3)
}
  0x44   :  { %66 = dma.hbm_to_vmem [thread:$0]  %s1607_s4, 256, %s1420_s26, [#allocation11], %s1342_s9, %s1342_s9, %s1343_s10  }
  0x45   :  { %1318 = dma.done.wait [#allocation5], 8192  }
  0x46   :  { %1319 = vsyncadd [#allocation5], 4294959104 }
  0x47   :  { %1320 = dma.done.wait [#allocation8], 4096  }
  0x48   :  { %1321 = vsyncadd [#allocation8], 4294963200 }
  0x49   :  { %1322 = dma.done.wait [#allocation11], 256  }
  0x4a   :  { %1323 = vsyncadd [#allocation11], 4294967040  ;;  %v1457_v0 = vld [vmem:[#allocation7] sm:$0xff]  ;;  %v1459_v1 = vld [vmem:[#allocation7 + $0x8] sm:$0xff]  ;;  %s1477_s4 = smov 0  }
  0x4b   :  { %v1461_v2 = vld [vmem:[#allocation7 + $0x10] sm:$0xff]  ;;  %v1463_v3 = vld [vmem:[#allocation7 + $0x18] sm:$0xff]  ;;  %v1465_v4 = vld [vmem:[#allocation7 + $0x20] sm:$0xff] }
  0x4c   :  { %v1467_v5 = vld [vmem:[#allocation7 + $0x28] sm:$0xff]  ;;  %v1469_v6 = vld [vmem:[#allocation7 + $0x30] sm:$0xff]  ;;  %v1471_v7 = vld [vmem:[#allocation7 + $0x38] sm:$0xff] }
  0x4d   :  { %v1473_v8 = vld [vmem:[#allocation7 + $0x40] sm:$0xff]  ;;  %v1475_v9 = vld [vmem:[#allocation7 + $0x48] sm:$0xff]  ;;  %v97_v10 = vld [vmem:[#allocation7 + $0x50] sm:$0xff] }
  0x4e   :  { %v98_v11 = vld [vmem:[#allocation7 + $0x58] sm:$0xff]  ;;  %v99_v12 = vld [vmem:[#allocation7 + $0x60] sm:$0xff]  ;;  %v100_v13 = vld [vmem:[#allocation7 + $0x68] sm:$0xff] }
  0x4f   :  { %v101_v14 = vld [vmem:[#allocation7 + $0x70] sm:$0xff]  ;;  %v102_v15 = vld [vmem:[#allocation7 + $0x78] sm:$0xff]  ;;  %v83_v16 = vld [vmem:[#allocation10] sm:$0xff]  }
  0x50   :  { %v84_v17 = vld [vmem:[#allocation10 + $0x8] sm:$0xff]   ;;  %v1332_v19 = vmov %v83_v16  }
  0x51   :  { %v1328_v18 = vmov %v84_v17  }
  0x52 LB: > { %v1058_v20 = vpack.c.bf16 %v1459_v1, %v1457_v0  ;;  %v1062_v21 = vpack.c.bf16 %v1463_v3, %v1461_v2  ;;  %v1066_v22 = vpack.c.bf16 %v1467_v5, %v1465_v4  ;;  %927 = vmatprep.mubr.f32.mxu0 %v1334_v19  ;;  %v1070_v23 = vpack.c.bf16 %v1471_v7, %v1469_v6  ;;  %s795_s21 = sshll.u32 %s1338_s4, 4  ;;  %s110_s4 = sadd.s32 1, %s1338_s4   ;;  %s1338_s4 = sphi %s1477_s4, %s110_s4   ;;  %v1334_v19 = vphi %v1332_v19, %v1173_v19   ;;  %v1330_v18 = vphi %v1328_v18, %v1171_v18  }
  0x53   : > { %v1074_v24 = vpack.c.bf16 %v1475_v9, %v1473_v8  ;;  %v1078_v25 = vpack.c.bf16 %v98_v11, %v97_v10  ;;  %v1082_v26 = vpack.c.bf16 %v100_v13, %v99_v12  ;;  %v1086_v27 = vpack.c.bf16 %v102_v15, %v101_v14  ;;  %s114_s22 = scalar_lea.vmem [#allocation4], %s795_s21  ;;  %s196_s23 = scalar_lea.vmem [#allocation3], %s795_s21 }
  0x54   : > { %1059 = vmatprep.subr.bf16.mxu0 %v1058_v20  ;;  %v116_v28 = vld [vmem:[%s114_s22 + $0x8] sm:$0xff]  ;;  %v115_v29 = vld [vmem:[%s114_s22] sm:$0xff]  ;;  %p107_p4 = scmp.ge.s32.totalorder %s110_s4, 32  }
  0x55   : > { %1061 = vmatpush3.bf16.msra.mxu0 %v1058_v20  ;;  %v273_v34 = vld [vmem:[#allocation9] sm:$0xff] (%p107_p4)  ;;  %v274_v35 = vld [vmem:[#allocation9 + $0x8] sm:$0xff] (%p107_p4)  ;;  %v275_v36 = vld [vmem:[#allocation9 + $0x10] sm:$0xff] (%p107_p4)  ;;  %s1346_s25 = smov (%p107_p4), [#allocation13]  }
  0x56   : > { %1063 = vmatprep.subr.bf16.mxu0 %v1062_v21  ;;  %v1090_v37 = vpack.c.bf16 (%p107_p4), %v274_v35, %v273_v34  ;;  %v276_v38 = vld [vmem:[#allocation9 + $0x18] sm:$0xff] (%p107_p4)  ;;  %v277_v40 = vld [vmem:[#allocation9 + $0x20] sm:$0xff] (%p107_p4)  ;;  %v278_v41 = vld [vmem:[#allocation9 + $0x28] sm:$0xff] (%p107_p4)  ;;  %s762_s26 = sshll.u32 (%p107_p4), %s1346_s25, 4  ;;  %s763_s26 = int_to_ptr.vmem [resolvable:$true] %s762_s26 }
  0x57   :  { %v1094_v39 = vpack.c.bf16 (%p107_p4), %v276_v38, %v275_v36  ;;  %v1098_v42 = vpack.c.bf16 (%p107_p4), %v278_v41, %v277_v40  ;;  %v279_v45 = vld [vmem:[#allocation9 + $0x30] sm:$0xff] (%p107_p4)  ;;  %v280_v46 = vld [vmem:[#allocation9 + $0x38] sm:$0xff] (%p107_p4)  ;;  %v281_v48 = vld [vmem:[#allocation9 + $0x40] sm:$0xff] (%p107_p4)  ;;  %s1262_s27 = scalar_lea.vmem (%p107_p4), %s763_s26, 256  ;;  %p1267_p6 = scmp.lt.s32.totalorder (%p107_p4), %s763_s26, %s763_s26 }
  0x58   :  { %1122 = vmatprep.subr.bf16.mxu1 (%p107_p4), %v1090_v37  ;;  %v1102_v47 = vpack.c.bf16 (%p107_p4), %v280_v46, %v279_v45  ;;  %v282_v49 = vld [vmem:[#allocation9 + $0x48] sm:$0xff] (%p107_p4)  ;;  %v283_v51 = vld [vmem:[#allocation9 + $0x50] sm:$0xff] (%p107_p4)  ;;  %v284_v52 = vld [vmem:[#allocation9 + $0x58] sm:$0xff] (%p107_p4)  ;;  %p1263_p5 = scmp.ne.s32.totalorder (%p107_p4), %s763_s26, %s1262_s27  ;;  %p1268_p7 = scmp.lt.s32.totalorder (%p107_p4), %s1262_s27, %s1262_s27 }
  0x59   : > { %1065 = vmatpush3.bf16.msra.mxu0 %v1062_v21  ;;  %1130 = vmatpush3.bf16.msra.mxu1 (%p107_p4), %v1090_v37  ;;  %v1106_v50 = vpack.c.bf16 (%p107_p4), %v282_v49, %v281_v48  ;;  %v1110_v53 = vpack.c.bf16 (%p107_p4), %v284_v52, %v283_v51  ;;  %v285_v54 = vld [vmem:[#allocation9 + $0x60] sm:$0xff] (%p107_p4)  ;;  %v286_v55 = vld [vmem:[#allocation9 + $0x68] sm:$0xff] (%p107_p4)  ;;  %v287_v57 = vld [vmem:[#allocation9 + $0x70] sm:$0xff] (%p107_p4) }
  0x5a   : > { %1067 = vmatprep.subr.bf16.mxu0 %v1066_v22  ;;  %1123 = vmatprep.subr.bf16.mxu1 (%p107_p4), %v1094_v39  ;;  %v1114_v56 = vpack.c.bf16 (%p107_p4), %v286_v55, %v285_v54  ;;  %v288_v58 = vld [vmem:[#allocation9 + $0x78] sm:$0xff] (%p107_p4)  ;;  %p1269_p8 = por (%p107_p4), %p1268_p7, %p1267_p6 }
  0x5b   :  { %v1118_v59 = vpack.c.bf16 (%p107_p4), %v288_v58, %v287_v57 }
  0x5c   :  { %p1270_p9 = pnand (%p107_p4), %p1269_p8, %p1263_p5 }
  0x5d   : > { %1069 = vmatpush3.bf16.msra.mxu0 %v1066_v22  ;;  %1131 = vmatpush3.bf16.msra.mxu1 (%p107_p4), %v1094_v39 }
  0x5e   : > { %1071 = vmatprep.subr.bf16.mxu0 %v1070_v23  ;;  %1124 = vmatprep.subr.bf16.mxu1 (%p107_p4), %v1098_v42 }
  0x61   : > { %1073 = vmatpush3.bf16.msra.mxu0 %v1070_v23  ;;  %1132 = vmatpush3.bf16.msra.mxu1 (%p107_p4), %v1098_v42 }
  0x62   : > { %1075 = vmatprep.subr.bf16.mxu0 %v1074_v24  ;;  %1125 = vmatprep.subr.bf16.mxu1 (%p107_p4), %v1102_v47 }
  0x65   : > { %1077 = vmatpush3.bf16.msra.mxu0 %v1074_v24  ;;  %1133 = vmatpush3.bf16.msra.mxu1 (%p107_p4), %v1102_v47 }
  0x66   : > { %1079 = vmatprep.subr.bf16.mxu0 %v1078_v25  ;;  %1126 = vmatprep.subr.bf16.mxu1 (%p107_p4), %v1106_v50 }
  0x69   : > { %1081 = vmatpush3.bf16.msra.mxu0 %v1078_v25  ;;  %1134 = vmatpush3.bf16.msra.mxu1 (%p107_p4), %v1106_v50 }
  0x6a   : > { %1083 = vmatprep.subr.bf16.mxu0 %v1082_v26  ;;  %1127 = vmatprep.subr.bf16.mxu1 (%p107_p4), %v1110_v53 }
  0x6d   : > { %1085 = vmatpush3.bf16.msra.mxu0 %v1082_v26  ;;  %1135 = vmatpush3.bf16.msra.mxu1 (%p107_p4), %v1110_v53 }
  0x6e   : > { %1087 = vmatprep.subr.bf16.mxu0 %v1086_v27  ;;  %1128 = vmatprep.subr.bf16.mxu1 (%p107_p4), %v1114_v56 }
  0x71   : > { %1089 = vmatpush3.bf16.msra.mxu0 %v1086_v27  ;;  %1136 = vmatpush3.bf16.msra.mxu1 (%p107_p4), %v1114_v56 }
  0x72   :  { %1091 = vmatprep.subr.bf16.mxu0 (%p107_p4), %v1090_v37  ;;  %1129 = vmatprep.subr.bf16.mxu1 (%p107_p4), %v1118_v59 }
  0x74   : > { %928 = vmatmul.mubr.f32.vlgmr.msra.gmra.mrb[0].mxu0 %v1330_v18 }
  0x75   :  { %1093 = vmatpush3.bf16.msra.mxu0 (%p107_p4), %v1090_v37  ;;  %1137 = vmatpush3.bf16.msra.mxu1 (%p107_p4), %v1118_v59 }
  0x76   :  { %1095 = vmatprep.subr.bf16.mxu0 (%p107_p4), %v1094_v39 }
  0x79   :  { %1097 = vmatpush3.bf16.msra.mxu0 (%p107_p4), %v1094_v39 }
  0x7a   :  { %1099 = vmatprep.subr.bf16.mxu0 (%p107_p4), %v1098_v42 }
  0x7d   :  { %1101 = vmatpush3.bf16.msra.mxu0 (%p107_p4), %v1098_v42 }
  0x7e   :  { %1103 = vmatprep.subr.bf16.mxu0 (%p107_p4), %v1102_v47 }
  0x81   :  { %1105 = vmatpush3.bf16.msra.mxu0 (%p107_p4), %v1102_v47 }
  0x82   :  { %1107 = vmatprep.subr.bf16.mxu0 (%p107_p4), %v1106_v50 }
  0x85   :  { %1109 = vmatpush3.bf16.msra.mxu0 (%p107_p4), %v1106_v50 }
  0x86   :  { %1111 = vmatprep.subr.bf16.mxu0 (%p107_p4), %v1110_v53 }
  0x89   :  { %1113 = vmatpush3.bf16.msra.mxu0 (%p107_p4), %v1110_v53 }
  0x8a   :  { %1115 = vmatprep.subr.bf16.mxu0 (%p107_p4), %v1114_v56 }
  0x8d   :  { %1117 = vmatpush3.bf16.msra.mxu0 (%p107_p4), %v1114_v56 }
  0x8e   :  { %1119 = vmatprep.subr.bf16.mxu0 (%p107_p4), %v1118_v59 }
  0x91   :  { %1121 = vmatpush3.bf16.msra.mxu0 (%p107_p4), %v1118_v59 }
 0x147   : > { %v929_v30 = vpop.f32.mrb[0].mxu0 }
 0x148   : > { %v193_v31 = vadd.f32 %v929_v30, %v116_v28  ;;  %v183_v32 = vpop.f32.mrb[1].mxu0 }
 0x149   : > { %v192_v33 = vadd.f32 %v183_v32, %v115_v29 }
 0x14a   : > { %1170 = vtanh.f32 %v193_v31 }
 0x14b   : > { %1172 = vtanh.f32 %v192_v33 }
 0x150   :  { %109 = sbr.rel (!%p107_p4) target bundleno = 82 (0x52), region = 82 }
 0x154   : > { %v1171_v18 = vpop.eup %1170  }
 0x155   : > { %v1173_v19 = vpop.eup %1172   ;;  %198 = vst [vmem:[%s196_s23 + $0x8] sm:$0xff] %v1171_v18 }
 0x156   : > { %197 = vst [vmem:[%s196_s23] sm:$0xff] %v1173_v19 }
 0x15d   :  { %v209_v43 = vld [vmem:[#allocation3] sm:$0xff]  ;;  %v1496_v60 = vld [vmem:[#allocation3 + $0x1f0] sm:$0xff]  ;;  %v1498_v61 = vld [vmem:[#allocation3 + $0x1f8] sm:$0xff] }
 0x15e   :  { %v241_v44 = vld [vmem:[#allocation3 + $0x100] sm:$0xff]  ;;  %962 = vmatprep.mubr.f32.mxu0 %v209_v43  ;;  %207 = vst [vmem:[#allocation13] sm:$0xff] %v1496_v60  ;;  %208 = vst [vmem:[#allocation13 + $0x8] sm:$0xff] %v1498_v61  ;;  %v210_v62 = vld [vmem:[#allocation3 + $0x8] sm:$0xff] }
 0x15f   :  { %1010 = vmatprep.mubr.f32.mxu1 %v241_v44  ;;  %v242_v63 = vld [vmem:[#allocation3 + $0x108] sm:$0xff]  ;;  %v211_v0 = vld [vmem:[#allocation3 + $0x10] sm:$0xff]  ;;  %963 = vmatmul.mubr.f32.vlgmr.msra.gmra.mrb[0].mxu0 %v210_v62  ;;  %v212_v2 = vld [vmem:[#allocation3 + $0x18] sm:$0xff] }
 0x160   :  { %v243_v1 = vld [vmem:[#allocation3 + $0x110] sm:$0xff]  ;;  %1011 = vmatmul.mubr.f32.vlgmr.msra.gmra.mrb[0].mxu1 %v242_v63  ;;  %965 = vmatprep.mubr.f32.mxu0 %v211_v0  ;;  %v244_v3 = vld [vmem:[#allocation3 + $0x118] sm:$0xff]  ;;  %v213_v4 = vld [vmem:[#allocation3 + $0x20] sm:$0xff] }
 0x161   :  { %1013 = vmatprep.mubr.f32.mxu1 %v243_v1  ;;  %v245_v5 = vld [vmem:[#allocation3 + $0x120] sm:$0xff]  ;;  %v214_v6 = vld [vmem:[#allocation3 + $0x28] sm:$0xff]  ;;  %v215_v8 = vld [vmem:[#allocation3 + $0x30] sm:$0xff] }
 0x162   :  { %v246_v7 = vld [vmem:[#allocation3 + $0x128] sm:$0xff]  ;;  %v247_v9 = vld [vmem:[#allocation3 + $0x130] sm:$0xff]  ;;  %v216_v10 = vld [vmem:[#allocation3 + $0x38] sm:$0xff] }
 0x163   :  { %966 = vmatmul.mubr.f32.gmra.mrb[2].mxu0 %v212_v2  ;;  %v248_v11 = vld [vmem:[#allocation3 + $0x138] sm:$0xff]  ;;  %v217_v12 = vld [vmem:[#allocation3 + $0x40] sm:$0xff]  ;;  %v218_v14 = vld [vmem:[#allocation3 + $0x48] sm:$0xff] }
 0x164   :  { %1014 = vmatmul.mubr.f32.gmra.mrb[2].mxu1 %v244_v3  ;;  %968 = vmatprep.mubr.f32.mxu0 %v213_v4  ;;  %v249_v13 = vld [vmem:[#allocation3 + $0x140] sm:$0xff]  ;;  %v250_v15 = vld [vmem:[#allocation3 + $0x148] sm:$0xff]  ;;  %v219_v16 = vld [vmem:[#allocation3 + $0x50] sm:$0xff] }
 0x165   :  { %1016 = vmatprep.mubr.f32.mxu1 %v245_v5  ;;  %v251_v17 = vld [vmem:[#allocation3 + $0x150] sm:$0xff]  ;;  %v220_v18 = vld [vmem:[#allocation3 + $0x58] sm:$0xff]  ;;  %v221_v20 = vld [vmem:[#allocation3 + $0x60] sm:$0xff] }
 0x166   :  { %v252_v19 = vld [vmem:[#allocation3 + $0x158] sm:$0xff]  ;;  %v253_v21 = vld [vmem:[#allocation3 + $0x160] sm:$0xff]  ;;  %v222_v22 = vld [vmem:[#allocation3 + $0x68] sm:$0xff] }
 0x167   :  { %969 = vmatmul.mubr.f32.gmra.mrb[4].mxu0 %v214_v6  ;;  %v254_v23 = vld [vmem:[#allocation3 + $0x168] sm:$0xff]  ;;  %v223_v24 = vld [vmem:[#allocation3 + $0x70] sm:$0xff]  ;;  %v224_v26 = vld [vmem:[#allocation3 + $0x78] sm:$0xff] }
 0x168   :  { %1017 = vmatmul.mubr.f32.gmra.mrb[4].mxu1 %v246_v7  ;;  %971 = vmatprep.mubr.f32.mxu0 %v215_v8  ;;  %v255_v25 = vld [vmem:[#allocation3 + $0x170] sm:$0xff]  ;;  %v256_v27 = vld [vmem:[#allocation3 + $0x178] sm:$0xff]  ;;  %v225_v28 = vld [vmem:[#allocation3 + $0x80] sm:$0xff] }
 0x169   :  { %1019 = vmatprep.mubr.f32.mxu1 %v247_v9  ;;  %v257_v29 = vld [vmem:[#allocation3 + $0x180] sm:$0xff]  ;;  %v226_v30 = vld [vmem:[#allocation3 + $0x88] sm:$0xff]  ;;  %v227_v32 = vld [vmem:[#allocation3 + $0x90] sm:$0xff] }
 0x16a   :  { %v258_v31 = vld [vmem:[#allocation3 + $0x188] sm:$0xff]  ;;  %v259_v33 = vld [vmem:[#allocation3 + $0x190] sm:$0xff]  ;;  %v228_v34 = vld [vmem:[#allocation3 + $0x98] sm:$0xff] }
 0x16b   :  { %972 = vmatmul.mubr.f32.gmra.mrb[6].mxu0 %v216_v10  ;;  %v260_v35 = vld [vmem:[#allocation3 + $0x198] sm:$0xff]  ;;  %v229_v36 = vld [vmem:[#allocation3 + $0xa0] sm:$0xff]  ;;  %v230_v38 = vld [vmem:[#allocation3 + $0xa8] sm:$0xff] }
 0x16c   :  { %1020 = vmatmul.mubr.f32.gmra.mrb[6].mxu1 %v248_v11  ;;  %974 = vmatprep.mubr.f32.mxu0 %v217_v12  ;;  %v261_v37 = vld [vmem:[#allocation3 + $0x1a0] sm:$0xff]  ;;  %v262_v39 = vld [vmem:[#allocation3 + $0x1a8] sm:$0xff]  ;;  %v231_v40 = vld [vmem:[#allocation3 + $0xb0] sm:$0xff] }
 0x16d   :  { %1022 = vmatprep.mubr.f32.mxu1 %v249_v13  ;;  %v263_v41 = vld [vmem:[#allocation3 + $0x1b0] sm:$0xff]  ;;  %v232_v42 = vld [vmem:[#allocation3 + $0xb8] sm:$0xff]  ;;  %v233_v44 = vld [vmem:[#allocation3 + $0xc0] sm:$0xff] }
 0x16e   :  { %v264_v43 = vld [vmem:[#allocation3 + $0x1b8] sm:$0xff]  ;;  %v265_v45 = vld [vmem:[#allocation3 + $0x1c0] sm:$0xff]  ;;  %v234_v46 = vld [vmem:[#allocation3 + $0xc8] sm:$0xff] }
 0x16f   :  { %975 = vmatmul.mubr.f32.gmra.mrb[8].mxu0 %v218_v14  ;;  %v266_v47 = vld [vmem:[#allocation3 + $0x1c8] sm:$0xff]  ;;  %v235_v48 = vld [vmem:[#allocation3 + $0xd0] sm:$0xff]  ;;  %v236_v50 = vld [vmem:[#allocation3 + $0xd8] sm:$0xff] }
 0x170   :  { %1023 = vmatmul.mubr.f32.gmra.mrb[8].mxu1 %v250_v15  ;;  %977 = vmatprep.mubr.f32.mxu0 %v219_v16  ;;  %v267_v49 = vld [vmem:[#allocation3 + $0x1d0] sm:$0xff]  ;;  %v268_v51 = vld [vmem:[#allocation3 + $0x1d8] sm:$0xff]  ;;  %v237_v52 = vld [vmem:[#allocation3 + $0xe0] sm:$0xff] }
 0x171   :  { %1025 = vmatprep.mubr.f32.mxu1 %v251_v17  ;;  %v269_v53 = vld [vmem:[#allocation3 + $0x1e0] sm:$0xff]  ;;  %v238_v54 = vld [vmem:[#allocation3 + $0xe8] sm:$0xff]  ;;  %v239_v56 = vld [vmem:[#allocation3 + $0xf0] sm:$0xff] }
 0x172   :  { %v270_v55 = vld [vmem:[#allocation3 + $0x1e8] sm:$0xff]  ;;  %v240_v57 = vld [vmem:[#allocation3 + $0xf8] sm:$0xff] }
 0x173   :  { %978 = vmatmul.mubr.f32.gmra.mrb[10].mxu0 %v220_v18 }
 0x174   :  { %1026 = vmatmul.mubr.f32.gmra.mrb[10].mxu1 %v252_v19  ;;  %980 = vmatprep.mubr.f32.mxu0 %v221_v20 }
 0x175   :  { %1028 = vmatprep.mubr.f32.mxu1 %v253_v21 }
 0x177   :  { %981 = vmatmul.mubr.f32.gmra.mrb[12].mxu0 %v222_v22 }
 0x178   :  { %1029 = vmatmul.mubr.f32.gmra.mrb[12].mxu1 %v254_v23  ;;  %983 = vmatprep.mubr.f32.mxu0 %v223_v24 }
 0x179   :  { %1031 = vmatprep.mubr.f32.mxu1 %v255_v25 }
 0x17b   :  { %984 = vmatmul.mubr.f32.gmra.mrb[14].mxu0 %v224_v26 }
 0x17c   :  { %1032 = vmatmul.mubr.f32.gmra.mrb[14].mxu1 %v256_v27  ;;  %986 = vmatprep.mubr.f32.mxu0 %v225_v28 }
 0x17d   :  { %1034 = vmatprep.mubr.f32.mxu1 %v257_v29 }
 0x17f   :  { %987 = vmatmul.mubr.f32.gmra.mrb[16].mxu0 %v226_v30 }
 0x180   :  { %1035 = vmatmul.mubr.f32.gmra.mrb[16].mxu1 %v258_v31  ;;  %989 = vmatprep.mubr.f32.mxu0 %v227_v32 }
 0x181   :  { %1037 = vmatprep.mubr.f32.mxu1 %v259_v33 }
 0x183   :  { %990 = vmatmul.mubr.f32.gmra.mrb[18].mxu0 %v228_v34 }
 0x184   :  { %1038 = vmatmul.mubr.f32.gmra.mrb[18].mxu1 %v260_v35  ;;  %992 = vmatprep.mubr.f32.mxu0 %v229_v36 }
 0x185   :  { %1040 = vmatprep.mubr.f32.mxu1 %v261_v37 }
 0x187   :  { %993 = vmatmul.mubr.f32.gmra.mrb[20].mxu0 %v230_v38 }
 0x188   :  { %1041 = vmatmul.mubr.f32.gmra.mrb[20].mxu1 %v262_v39  ;;  %995 = vmatprep.mubr.f32.mxu0 %v231_v40 }
 0x189   :  { %1043 = vmatprep.mubr.f32.mxu1 %v263_v41 }
 0x18b   :  { %996 = vmatmul.mubr.f32.gmra.mrb[22].mxu0 %v232_v42 }
 0x18c   :  { %1044 = vmatmul.mubr.f32.gmra.mrb[22].mxu1 %v264_v43  ;;  %998 = vmatprep.mubr.f32.mxu0 %v233_v44 }
 0x18d   :  { %1046 = vmatprep.mubr.f32.mxu1 %v265_v45 }
 0x18f   :  { %999 = vmatmul.mubr.f32.gmra.mrb[24].mxu0 %v234_v46 }
 0x190   :  { %1047 = vmatmul.mubr.f32.gmra.mrb[24].mxu1 %v266_v47  ;;  %1001 = vmatprep.mubr.f32.mxu0 %v235_v48 }
 0x191   :  { %1049 = vmatprep.mubr.f32.mxu1 %v267_v49 }
 0x193   :  { %1002 = vmatmul.mubr.f32.gmra.mrb[26].mxu0 %v236_v50 }
 0x194   :  { %1050 = vmatmul.mubr.f32.gmra.mrb[26].mxu1 %v268_v51  ;;  %1004 = vmatprep.mubr.f32.mxu0 %v237_v52 }
 0x195   :  { %1052 = vmatprep.mubr.f32.mxu1 %v269_v53 }
 0x197   :  { %1005 = vmatmul.mubr.f32.gmra.mrb[28].mxu0 %v238_v54 }
 0x198   :  { %1053 = vmatmul.mubr.f32.gmra.mrb[28].mxu1 %v270_v55  ;;  %1007 = vmatprep.mubr.f32.mxu0 %v239_v56 }
 0x199   :  { %1055 = vmatprep.mubr.f32.mxu1 %v1496_v60 }
 0x19b   :  { %1008 = vmatmul.mubr.f32.gmra.mrb[30].mxu0 %v240_v57 }
 0x19c   :  { %1056 = vmatmul.mubr.f32.gmra.mrb[30].mxu1 %v1498_v61 }
 0x19d   :  { %1273 = shalt.err (!%p1270_p9)
}
 0x19e   :  { %s1274_s30 = scalar_lea.hbm %s1609_s6, 256 }
 0x19f   :  { %p1275_p10 = scmp.ne.s32.totalorder %s1609_s6, %s1274_s30  ;;  %p1278_p11 = scmp.lt.u32.totalorder %s1274_s30, %s1609_s6 }
 0x1a1   :  { %p1280_p12 = pnand %p1278_p11, %p1275_p10 }
 0x1a3   :  { %1283 = shalt.err (!%p1280_p12)
}
 0x1a4   :  { %768 = dma.vmem_to_hbm [thread:$0]  %s763_s26, 256, %s1609_s6, [#allocation14], %s1342_s9, %s1342_s9, %s1343_s10  }
 0x1a5   :  { %v1522_v58 = vld [vmem:[%s1606_s3] ss:$0 sm:$0xff]  ;;  %s1347_s3 = smov [#allocation12]  }
 0x1a6   :  { %s750_s6 = sshll.u32 %s1347_s3, 4  ;;  %s751_s6 = int_to_ptr.vmem [resolvable:$true] %s750_s6 }
 0x1a7   :  { %s1284_s15 = scalar_lea.vmem %s751_s6, 8192  ;;  %p1289_p0 = scmp.lt.s32.totalorder %s751_s6, %s751_s6 }
 0x1a8   :  { %p1285_p13 = scmp.ne.s32.totalorder %s751_s6, %s1284_s15  ;;  %p1290_p1 = scmp.lt.s32.totalorder %s1284_s15, %s1284_s15 }
 0x1aa   :  { %p1291_p2 = por %p1290_p1, %p1289_p0 }
 0x1ac   :  { %p1292_p3 = pnand %p1291_p2, %p1285_p13 }
 0x232   :  { %v964_v59 = vpop.f32.mrb[0].mxu0 }
 0x233   :  { %v1012_v60 = vpop.f32.mrb[0].mxu1  ;;  %v368_v61 = vadd.f32 %v964_v59, %v1522_v58  ;;  %v362_v63 = vpop.f32.mrb[1].mxu0 }
 0x234   :  { %v528_v62 = vadd.f32 %v1012_v60, %v1522_v58  ;;  %v522_v0 = vpop.f32.mrb[1].mxu1  ;;  %v363_v1 = vadd.f32 %v1522_v58, %v362_v63 }
 0x235   :  { %v523_v2 = vadd.f32 %v1522_v58, %v522_v0  ;;  %682 = vst [vmem:[#allocation12 + $0x8] sm:$0xff] %v368_v61 }
 0x236   :  { %714 = vst [vmem:[#allocation12 + $0x108] sm:$0xff] %v528_v62  ;;  %681 = vst [vmem:[#allocation12] sm:$0xff] %v363_v1  ;;  %v967_v3 = vpop.f32.mrb[2].mxu0 }
 0x237   :  { %713 = vst [vmem:[#allocation12 + $0x100] sm:$0xff] %v523_v2  ;;  %v1015_v4 = vpop.f32.mrb[2].mxu1  ;;  %v378_v5 = vadd.f32 %v967_v3, %v1522_v58  ;;  %v372_v7 = vpop.f32.mrb[3].mxu0 }
 0x238   :  { %v538_v6 = vadd.f32 %v1015_v4, %v1522_v58  ;;  %v532_v8 = vpop.f32.mrb[3].mxu1  ;;  %v373_v9 = vadd.f32 %v1522_v58, %v372_v7 }
 0x239   :  { %v533_v10 = vadd.f32 %v1522_v58, %v532_v8  ;;  %684 = vst [vmem:[#allocation12 + $0x18] sm:$0xff] %v378_v5 }
 0x23a   :  { %716 = vst [vmem:[#allocation12 + $0x118] sm:$0xff] %v538_v6  ;;  %683 = vst [vmem:[#allocation12 + $0x10] sm:$0xff] %v373_v9  ;;  %v970_v11 = vpop.f32.mrb[4].mxu0 }
 0x23b   :  { %715 = vst [vmem:[#allocation12 + $0x110] sm:$0xff] %v533_v10  ;;  %v1018_v12 = vpop.f32.mrb[4].mxu1  ;;  %v388_v13 = vadd.f32 %v970_v11, %v1522_v58  ;;  %v382_v15 = vpop.f32.mrb[5].mxu0 }
 0x23c   :  { %v548_v14 = vadd.f32 %v1018_v12, %v1522_v58  ;;  %v542_v16 = vpop.f32.mrb[5].mxu1  ;;  %v383_v17 = vadd.f32 %v1522_v58, %v382_v15 }
 0x23d   :  { %v543_v18 = vadd.f32 %v1522_v58, %v542_v16  ;;  %686 = vst [vmem:[#allocation12 + $0x28] sm:$0xff] %v388_v13 }
 0x23e   :  { %718 = vst [vmem:[#allocation12 + $0x128] sm:$0xff] %v548_v14  ;;  %685 = vst [vmem:[#allocation12 + $0x20] sm:$0xff] %v383_v17  ;;  %v973_v19 = vpop.f32.mrb[6].mxu0 }
 0x23f   :  { %717 = vst [vmem:[#allocation12 + $0x120] sm:$0xff] %v543_v18  ;;  %v1021_v20 = vpop.f32.mrb[6].mxu1  ;;  %v398_v21 = vadd.f32 %v973_v19, %v1522_v58  ;;  %v392_v23 = vpop.f32.mrb[7].mxu0 }
 0x240   :  { %v558_v22 = vadd.f32 %v1021_v20, %v1522_v58  ;;  %v552_v24 = vpop.f32.mrb[7].mxu1  ;;  %v393_v25 = vadd.f32 %v1522_v58, %v392_v23 }
 0x241   :  { %v553_v26 = vadd.f32 %v1522_v58, %v552_v24  ;;  %688 = vst [vmem:[#allocation12 + $0x38] sm:$0xff] %v398_v21 }
 0x242   :  { %720 = vst [vmem:[#allocation12 + $0x138] sm:$0xff] %v558_v22  ;;  %687 = vst [vmem:[#allocation12 + $0x30] sm:$0xff] %v393_v25  ;;  %v976_v27 = vpop.f32.mrb[8].mxu0 }
 0x243   :  { %719 = vst [vmem:[#allocation12 + $0x130] sm:$0xff] %v553_v26  ;;  %v1024_v28 = vpop.f32.mrb[8].mxu1  ;;  %v408_v29 = vadd.f32 %v976_v27, %v1522_v58  ;;  %v402_v31 = vpop.f32.mrb[9].mxu0 }
 0x244   :  { %v568_v30 = vadd.f32 %v1024_v28, %v1522_v58  ;;  %v562_v32 = vpop.f32.mrb[9].mxu1  ;;  %v403_v33 = vadd.f32 %v1522_v58, %v402_v31 }
 0x245   :  { %v563_v34 = vadd.f32 %v1522_v58, %v562_v32  ;;  %690 = vst [vmem:[#allocation12 + $0x48] sm:$0xff] %v408_v29 }
 0x246   :  { %722 = vst [vmem:[#allocation12 + $0x148] sm:$0xff] %v568_v30  ;;  %689 = vst [vmem:[#allocation12 + $0x40] sm:$0xff] %v403_v33  ;;  %v979_v35 = vpop.f32.mrb[10].mxu0 }
 0x247   :  { %721 = vst [vmem:[#allocation12 + $0x140] sm:$0xff] %v563_v34  ;;  %v1027_v36 = vpop.f32.mrb[10].mxu1  ;;  %v418_v37 = vadd.f32 %v979_v35, %v1522_v58  ;;  %v412_v39 = vpop.f32.mrb[11].mxu0 }
 0x248   :  { %v578_v38 = vadd.f32 %v1027_v36, %v1522_v58  ;;  %v572_v40 = vpop.f32.mrb[11].mxu1  ;;  %v413_v41 = vadd.f32 %v1522_v58, %v412_v39 }
 0x249   :  { %v573_v42 = vadd.f32 %v1522_v58, %v572_v40  ;;  %692 = vst [vmem:[#allocation12 + $0x58] sm:$0xff] %v418_v37 }
 0x24a   :  { %724 = vst [vmem:[#allocation12 + $0x158] sm:$0xff] %v578_v38  ;;  %691 = vst [vmem:[#allocation12 + $0x50] sm:$0xff] %v413_v41  ;;  %v982_v43 = vpop.f32.mrb[12].mxu0 }
 0x24b   :  { %723 = vst [vmem:[#allocation12 + $0x150] sm:$0xff] %v573_v42  ;;  %v1030_v44 = vpop.f32.mrb[12].mxu1  ;;  %v428_v45 = vadd.f32 %v982_v43, %v1522_v58  ;;  %v422_v47 = vpop.f32.mrb[13].mxu0 }
 0x24c   :  { %v588_v46 = vadd.f32 %v1030_v44, %v1522_v58  ;;  %v582_v48 = vpop.f32.mrb[13].mxu1  ;;  %v423_v49 = vadd.f32 %v1522_v58, %v422_v47 }
 0x24d   :  { %v583_v50 = vadd.f32 %v1522_v58, %v582_v48  ;;  %694 = vst [vmem:[#allocation12 + $0x68] sm:$0xff] %v428_v45 }
 0x24e   :  { %726 = vst [vmem:[#allocation12 + $0x168] sm:$0xff] %v588_v46  ;;  %693 = vst [vmem:[#allocation12 + $0x60] sm:$0xff] %v423_v49  ;;  %v985_v51 = vpop.f32.mrb[14].mxu0 }
 0x24f   :  { %725 = vst [vmem:[#allocation12 + $0x160] sm:$0xff] %v583_v50  ;;  %v1033_v52 = vpop.f32.mrb[14].mxu1  ;;  %v438_v53 = vadd.f32 %v985_v51, %v1522_v58  ;;  %v432_v55 = vpop.f32.mrb[15].mxu0 }
 0x250   :  { %v598_v54 = vadd.f32 %v1033_v52, %v1522_v58  ;;  %v592_v56 = vpop.f32.mrb[15].mxu1  ;;  %v433_v57 = vadd.f32 %v1522_v58, %v432_v55 }
 0x251   :  { %v593_v59 = vadd.f32 %v1522_v58, %v592_v56  ;;  %696 = vst [vmem:[#allocation12 + $0x78] sm:$0xff] %v438_v53 }
 0x252   :  { %728 = vst [vmem:[#allocation12 + $0x178] sm:$0xff] %v598_v54  ;;  %695 = vst [vmem:[#allocation12 + $0x70] sm:$0xff] %v433_v57  ;;  %v988_v60 = vpop.f32.mrb[16].mxu0 }
 0x253   :  { %727 = vst [vmem:[#allocation12 + $0x170] sm:$0xff] %v593_v59  ;;  %v1036_v61 = vpop.f32.mrb[16].mxu1  ;;  %v448_v62 = vadd.f32 %v988_v60, %v1522_v58  ;;  %v442_v0 = vpop.f32.mrb[17].mxu0 }
 0x254   :  { %v608_v63 = vadd.f32 %v1036_v61, %v1522_v58  ;;  %v602_v1 = vpop.f32.mrb[17].mxu1  ;;  %v443_v2 = vadd.f32 %v1522_v58, %v442_v0 }
 0x255   :  { %v603_v3 = vadd.f32 %v1522_v58, %v602_v1  ;;  %698 = vst [vmem:[#allocation12 + $0x88] sm:$0xff] %v448_v62 }
 0x256   :  { %730 = vst [vmem:[#allocation12 + $0x188] sm:$0xff] %v608_v63  ;;  %697 = vst [vmem:[#allocation12 + $0x80] sm:$0xff] %v443_v2  ;;  %v991_v4 = vpop.f32.mrb[18].mxu0 }
 0x257   :  { %729 = vst [vmem:[#allocation12 + $0x180] sm:$0xff] %v603_v3  ;;  %v1039_v5 = vpop.f32.mrb[18].mxu1  ;;  %v458_v6 = vadd.f32 %v991_v4, %v1522_v58  ;;  %v452_v8 = vpop.f32.mrb[19].mxu0 }
 0x258   :  { %v618_v7 = vadd.f32 %v1039_v5, %v1522_v58  ;;  %v612_v9 = vpop.f32.mrb[19].mxu1  ;;  %v453_v10 = vadd.f32 %v1522_v58, %v452_v8 }
 0x259   :  { %v613_v11 = vadd.f32 %v1522_v58, %v612_v9  ;;  %700 = vst [vmem:[#allocation12 + $0x98] sm:$0xff] %v458_v6 }
 0x25a   :  { %732 = vst [vmem:[#allocation12 + $0x198] sm:$0xff] %v618_v7  ;;  %699 = vst [vmem:[#allocation12 + $0x90] sm:$0xff] %v453_v10  ;;  %v994_v12 = vpop.f32.mrb[20].mxu0 }
 0x25b   :  { %731 = vst [vmem:[#allocation12 + $0x190] sm:$0xff] %v613_v11  ;;  %v1042_v13 = vpop.f32.mrb[20].mxu1  ;;  %v468_v14 = vadd.f32 %v994_v12, %v1522_v58  ;;  %v462_v16 = vpop.f32.mrb[21].mxu0 }
 0x25c   :  { %v628_v15 = vadd.f32 %v1042_v13, %v1522_v58  ;;  %v622_v17 = vpop.f32.mrb[21].mxu1  ;;  %v463_v18 = vadd.f32 %v1522_v58, %v462_v16 }
 0x25d   :  { %v623_v19 = vadd.f32 %v1522_v58, %v622_v17  ;;  %702 = vst [vmem:[#allocation12 + $0xa8] sm:$0xff] %v468_v14 }
 0x25e   :  { %734 = vst [vmem:[#allocation12 + $0x1a8] sm:$0xff] %v628_v15  ;;  %701 = vst [vmem:[#allocation12 + $0xa0] sm:$0xff] %v463_v18  ;;  %v997_v20 = vpop.f32.mrb[22].mxu0 }
 0x25f   :  { %733 = vst [vmem:[#allocation12 + $0x1a0] sm:$0xff] %v623_v19  ;;  %v1045_v21 = vpop.f32.mrb[22].mxu1  ;;  %v478_v22 = vadd.f32 %v997_v20, %v1522_v58  ;;  %v472_v24 = vpop.f32.mrb[23].mxu0 }
 0x260   :  { %v638_v23 = vadd.f32 %v1045_v21, %v1522_v58  ;;  %v632_v25 = vpop.f32.mrb[23].mxu1  ;;  %v473_v26 = vadd.f32 %v1522_v58, %v472_v24 }
 0x261   :  { %v633_v27 = vadd.f32 %v1522_v58, %v632_v25  ;;  %704 = vst [vmem:[#allocation12 + $0xb8] sm:$0xff] %v478_v22 }
 0x262   :  { %736 = vst [vmem:[#allocation12 + $0x1b8] sm:$0xff] %v638_v23  ;;  %703 = vst [vmem:[#allocation12 + $0xb0] sm:$0xff] %v473_v26  ;;  %v1000_v28 = vpop.f32.mrb[24].mxu0 }
 0x263   :  { %735 = vst [vmem:[#allocation12 + $0x1b0] sm:$0xff] %v633_v27  ;;  %v1048_v29 = vpop.f32.mrb[24].mxu1  ;;  %v488_v30 = vadd.f32 %v1000_v28, %v1522_v58  ;;  %v482_v32 = vpop.f32.mrb[25].mxu0 }
 0x264   :  { %v648_v31 = vadd.f32 %v1048_v29, %v1522_v58  ;;  %v642_v33 = vpop.f32.mrb[25].mxu1  ;;  %v483_v34 = vadd.f32 %v1522_v58, %v482_v32 }
 0x265   :  { %v643_v35 = vadd.f32 %v1522_v58, %v642_v33  ;;  %706 = vst [vmem:[#allocation12 + $0xc8] sm:$0xff] %v488_v30 }
 0x266   :  { %738 = vst [vmem:[#allocation12 + $0x1c8] sm:$0xff] %v648_v31  ;;  %705 = vst [vmem:[#allocation12 + $0xc0] sm:$0xff] %v483_v34  ;;  %v1003_v36 = vpop.f32.mrb[26].mxu0 }
 0x267   :  { %737 = vst [vmem:[#allocation12 + $0x1c0] sm:$0xff] %v643_v35  ;;  %v1051_v37 = vpop.f32.mrb[26].mxu1  ;;  %v498_v38 = vadd.f32 %v1003_v36, %v1522_v58  ;;  %v492_v40 = vpop.f32.mrb[27].mxu0 }
 0x268   :  { %v658_v39 = vadd.f32 %v1051_v37, %v1522_v58  ;;  %v652_v41 = vpop.f32.mrb[27].mxu1  ;;  %v493_v42 = vadd.f32 %v1522_v58, %v492_v40 }
 0x269   :  { %v653_v43 = vadd.f32 %v1522_v58, %v652_v41  ;;  %708 = vst [vmem:[#allocation12 + $0xd8] sm:$0xff] %v498_v38 }
 0x26a   :  { %740 = vst [vmem:[#allocation12 + $0x1d8] sm:$0xff] %v658_v39  ;;  %707 = vst [vmem:[#allocation12 + $0xd0] sm:$0xff] %v493_v42  ;;  %v1006_v44 = vpop.f32.mrb[28].mxu0 }
 0x26b   :  { %739 = vst [vmem:[#allocation12 + $0x1d0] sm:$0xff] %v653_v43  ;;  %v1054_v45 = vpop.f32.mrb[28].mxu1  ;;  %v508_v46 = vadd.f32 %v1006_v44, %v1522_v58  ;;  %v502_v48 = vpop.f32.mrb[29].mxu0 }
 0x26c   :  { %v668_v47 = vadd.f32 %v1054_v45, %v1522_v58  ;;  %v662_v49 = vpop.f32.mrb[29].mxu1  ;;  %v503_v50 = vadd.f32 %v1522_v58, %v502_v48 }
 0x26d   :  { %v663_v51 = vadd.f32 %v1522_v58, %v662_v49  ;;  %710 = vst [vmem:[#allocation12 + $0xe8] sm:$0xff] %v508_v46 }
 0x26e   :  { %742 = vst [vmem:[#allocation12 + $0x1e8] sm:$0xff] %v668_v47  ;;  %709 = vst [vmem:[#allocation12 + $0xe0] sm:$0xff] %v503_v50  ;;  %v1009_v52 = vpop.f32.mrb[30].mxu0 }
 0x26f   :  { %741 = vst [vmem:[#allocation12 + $0x1e0] sm:$0xff] %v663_v51  ;;  %v1057_v53 = vpop.f32.mrb[30].mxu1  ;;  %v518_v54 = vadd.f32 %v1009_v52, %v1522_v58  ;;  %v512_v56 = vpop.f32.mrb[31].mxu0 }
 0x270   :  { %v678_v55 = vadd.f32 %v1057_v53, %v1522_v58  ;;  %v672_v57 = vpop.f32.mrb[31].mxu1  ;;  %v513_v59 = vadd.f32 %v1522_v58, %v512_v56 }
 0x271   :  { %v673_v60 = vadd.f32 %v1522_v58, %v672_v57  ;;  %712 = vst [vmem:[#allocation12 + $0xf8] sm:$0xff] %v518_v54 }
 0x272   :  { %744 = vst [vmem:[#allocation12 + $0x1f8] sm:$0xff] %v678_v55  ;;  %711 = vst [vmem:[#allocation12 + $0xf0] sm:$0xff] %v513_v59 }
 0x273   :  { %743 = vst [vmem:[#allocation12 + $0x1f0] sm:$0xff] %v673_v60 }
 0x274   :  { %1295 = shalt.err (!%p1292_p3)
}
 0x275   :  { %s1296_s18 = scalar_lea.hbm %s1608_s5, 8192 }
 0x276   :  { %p1297_p4 = scmp.ne.s32.totalorder %s1608_s5, %s1296_s18  ;;  %p1300_p5 = scmp.lt.u32.totalorder %s1296_s18, %s1608_s5 }
 0x278   :  { %p1302_p6 = pnand %p1300_p5, %p1297_p4 }
 0x27a   :  { %1305 = shalt.err (!%p1302_p6)
}
 0x27b   :  { %756 = dma.vmem_to_hbm [thread:$0]  %s751_s6, 8192, %s1608_s5, [#allocation6], %s1342_s9, %s1342_s9, %s1343_s10  }
 0x27c   :  { %1324 = dma.done.wait [#allocation6], 8192  }
 0x27d   :  { %1325 = vsyncadd [#allocation6], 4294959104 }
 0x27e   :  { %1326 = dma.done.wait [#allocation14], 256  }
 0x27f   :  { %1327 = vsyncadd [#allocation14], 4294967040 }
 0x280   :  { %775 = vsyncpa [#allocation5], 1 }
 0x281   :  { %776 = vsyncpa [#allocation8], 1 }
 0x282   :  { %777 = vsyncpa [#allocation11], 1 }
 0x283   :  { %778 = vsyncpa [#allocation6], 1 }
 0x284   :  { %779 = vsyncpa [#allocation14], 1 }

</bundles_post_ra>
